<compile_context>
chip_gen: v7x
topology: tpu7x:2x2x1
jax: 0.10.0
libtpu: 0.0.40
codegen_flags: <defaults>
</compile_context>

<pallas_src>
import jax
import jax.numpy as jnp
from jax.experimental import pallas as pl
from jax.experimental.pallas import tpu as pltpu


def _round_up(x, m):
    return -(-x // m) * m


def _cdiv(a, b):
    return -(-a // b)


def _vmem_capacity_bytes():
    """Trace-time hardware query; fall back to the smallest per-core VMEM
    across supported generations (v7x: 64 MiB/TC) if unavailable."""
    try:
        return int(pltpu.get_tpu_info().vmem_capacity_bytes)
    except Exception:
        return 64 * 1024 * 1024


def _mlp_kernel(x_ref, w1_ref, b1_ref, w2_ref, b2_ref, w3_ref, b3_ref, o_ref):
    # fc1 + ReLU  (MXU matmul, f32 accumulation; biases stay f32 and are added
    # onto the f32 accumulator, so the bf16 path only rounds at the dot inputs)
    h1 = jnp.dot(x_ref[...], w1_ref[...], preferred_element_type=jnp.float32)
    h1 = jnp.maximum(h1 + b1_ref[...], 0.0)
    # fc2 + ReLU
    h2 = jnp.dot(h1.astype(w2_ref.dtype), w2_ref[...],
                 preferred_element_type=jnp.float32)
    h2 = jnp.maximum(h2 + b2_ref[...], 0.0)
    # fc3 (logits, no activation); output last dim is lane-dense (multiple of 128)
    logits = jnp.dot(h2.astype(w3_ref.dtype), w3_ref[...],
                     preferred_element_type=jnp.float32)
    o_ref[...] = (logits + b3_ref[...]).astype(o_ref.dtype)


def prepare_params(params, *, compute_dtype=jnp.bfloat16):
    """One-time weight preparation, hoisted out of the forward path.

    * pads in_dim / hidden_dim / num_classes up to multiples of 128 (zero pad,
      results unchanged),
    * casts the weight matrices to `compute_dtype` (bf16 default; None -> f32),
      while biases stay f32 (added onto the f32 MXU accumulator).
    Call once and reuse the returned dict across forward calls.
    """
    w1, b1, w2, b2, w3, b3 = (
        params["w1"], params["b1"], params["w2"],
        params["b2"], params["w3"], params["b3"],
    )
    in_dim, hidden_dim = w1.shape
    num_classes = w3.shape[1]

    in_pad = _round_up(in_dim, 128)
    hid_pad = _round_up(hidden_dim, 128)
    nc_pad = _round_up(max(num_classes, 128), 128)   # lane-dense output

    def pad2(a, rows, cols):
        return jnp.pad(a, ((0, rows - a.shape[0]), (0, cols - a.shape[1])))

    w1 = pad2(w1, in_pad, hid_pad)
    b1 = pad2(b1, 1, hid_pad)
    w2 = pad2(w2, hid_pad, hid_pad)
    b2 = pad2(b2, 1, hid_pad)
    w3 = pad2(w3, hid_pad, nc_pad)
    b3 = pad2(b3, 1, nc_pad)

    cdt = jnp.float32 if compute_dtype is None else compute_dtype
    w1, w2, w3 = (w.astype(cdt) for w in (w1, w2, w3))
    # biases stay f32.

    return dict(
        w1=w1, b1=b1, w2=w2, b2=b2, w3=w3, b3=b3,
        in_dim=in_dim, in_pad=in_pad, hid_pad=hid_pad,
        num_classes=num_classes, nc_pad=nc_pad,
        compute_dtype=cdt,
    )


def task_classifier_forward(x, prep, *, tm_cap=1024):
    """Forward pass of TaskClassifier.

    x:      (B, action_dim*seq_len) array (f32 or bf16; cast to the prepared
            compute dtype inside).
    prep:   dict from prepare_params().
    tm_cap: upper bound on the batch tile (rows per grid step); the actual tile
            is derived from the device's VMEM capacity.
    """
    B, in_dim = x.shape
    assert in_dim == prep["in_dim"], "x feature dim does not match prepared params"
    in_pad, hid_pad, nc_pad = prep["in_pad"], prep["hid_pad"], prep["nc_pad"]
    num_classes = prep["num_classes"]
    cdt = prep["compute_dtype"]
    out_dtype = cdt   # bf16 writeback when streaming bf16 (halves the padded out stream)

    x = x.astype(cdt)
    if in_pad != in_dim:
        # Only when in_dim % 128 != 0: a single (fused) pad pass buys dense MXU
        # lanes on the fc1 contraction; padded w1 rows are zero -> same result.
        x = jnp.pad(x, ((0, 0), (0, in_pad - in_dim)))

    weights = (prep["w1"], prep["b1"], prep["w2"], prep["b2"], prep["w3"], prep["b3"])
    weight_bytes = sum(int(a.size) * a.dtype.itemsize for a in weights)
    x_isz = x.dtype.itemsize
    o_isz = prep["w1"].dtype.itemsize   # out dtype == compute dtype

    # ---- VMEM-driven batch tile -------------------------------------------------
    # per-row bytes: double-buffered x tile + double-buffered out tile + f32 h1/h2
    # temporaries (with slack for bf16 cast copies).
    per_row = 2 * in_pad * x_isz + 2 * nc_pad * o_isz + 3 * hid_pad * 4
    cap = _vmem_capacity_bytes()
    budget = int(cap * 0.75)                       # headroom for compiler scratch
    avail = budget - 2 * weight_bytes              # resident operands double-buffered
    tm = max(16, avail // per_row) if avail > 0 else 16
    tm = min(tm, tm_cap, _round_up(B, 16))
    # keep >=2 grid steps when B allows it so the "parallel" batch axis can occupy
    # both TensorCores on v7x (one block is never split across cores).
    tm = min(tm, max(16, _round_up(_cdiv(B, 2), 16)))
    tm = max(16, (tm // 16) * 16)                  # sublane multiple (f32 & bf16 packing)

    grid = (_cdiv(B, tm),)                         # partial last block, no batch pad
    footprint = 2 * weight_bytes + tm * per_row
    vmem_limit = int(min(cap, footprint + (16 << 20)))

    resident = lambda i: (0, 0)   # constant block index -> operand stays in VMEM

    flops = 2 * B * (in_pad * hid_pad + hid_pad * hid_pad + hid_pad * nc_pad)
    bytes_accessed = int(B * in_pad * x_isz + weight_bytes + B * nc_pad * o_isz)

    out = pl.pallas_call(
        _mlp_kernel,
        out_shape=jax.ShapeDtypeStruct((B, nc_pad), out_dtype),
        grid_spec=pltpu.PrefetchScalarGridSpec(
            num_scalar_prefetch=0,
            grid=grid,
            in_specs=[
                pl.BlockSpec((tm, in_pad), lambda i: (i, 0)),   # streamed batch tile
                pl.BlockSpec(prep["w1"].shape, resident),
                pl.BlockSpec(prep["b1"].shape, resident),
                pl.BlockSpec(prep["w2"].shape, resident),
                pl.BlockSpec(prep["b2"].shape, resident),
                pl.BlockSpec(prep["w3"].shape, resident),
                pl.BlockSpec(prep["b3"].shape, resident),
            ],
            out_specs=pl.BlockSpec((tm, nc_pad), lambda i: (i, 0)),
        ),
        compiler_params=pltpu.CompilerParams(
            # batch tiles are independent -> shard grid across the 2 TCs on v7x
            dimension_semantics=("parallel",),
            vmem_limit_bytes=vmem_limit,
        ),
        cost_estimate=pl.CostEstimate(
            flops=flops, transcendentals=0, bytes_accessed=bytes_accessed),
    )(x, *weights)

    # slice away the lane-dense class padding (batch has no padding: partial block)
    return out[:, :num_classes]


def init_params(key, action_dim, seq_len, hidden_dim, num_classes):
    """Deterministic init mimicking nn.Linear default (U[-1/sqrt(fan_in), 1/sqrt(fan_in)])."""
    in_dim = action_dim * seq_len
    ks = jax.random.split(key, 6)

    def lin(kw, kb, fan_in, fan_out):
        bound = 1.0 / jnp.sqrt(fan_in)
        w = jax.random.uniform(kw, (fan_in, fan_out), jnp.float32, -bound, bound)
        b = jax.random.uniform(kb, (1, fan_out), jnp.float32, -bound, bound)
        return w, b

    w1, b1 = lin(ks[0], ks[1], in_dim, hidden_dim)
    w2, b2 = lin(ks[2], ks[3], hidden_dim, hidden_dim)
    w3, b3 = lin(ks[4], ks[5], hidden_dim, num_classes)
    return {"w1": w1, "b1": b1, "w2": w2, "b2": b2, "w3": w3, "b3": b3}


if __name__ == "__main__":
    # Small shapes consistent with the module's forward.
    batch = 2
    action_dim = 4
    seq_len = 8
    hidden_dim = 32
    num_classes = 8

    key = jax.random.PRNGKey(0)
    kx, kp = jax.random.split(key)

    x = jax.random.normal(kx, (batch, action_dim * seq_len), jnp.float32)
    params = init_params(kp, action_dim, seq_len, hidden_dim, num_classes)

    # Pure-JAX reference.
    def ref(x, p):
        h = jnp.maximum(x @ p["w1"] + p["b1"], 0.0)
        h = jnp.maximum(h @ p["w2"] + p["b2"], 0.0)
        return h @ p["w3"] + p["b3"]

    expected = ref(x, params)

    # Exact f32 path.
    prep_f32 = prepare_params(params, compute_dtype=None)
    logits = task_classifier_forward(x, prep_f32)
    jax.block_until_ready(logits)
    assert logits.shape == (batch, num_classes)
    assert jnp.allclose(logits, expected, atol=1e-5, rtol=1e-5)

    # Default bf16 streaming path (f32 MXU accumulation, bf16 writeback).
    prep_bf16 = prepare_params(params)   # compute_dtype=jnp.bfloat16 by default
    logits_bf16 = task_classifier_forward(x, prep_bf16)
    jax.block_until_ready(logits_bf16)
    assert logits_bf16.shape == (batch, num_classes)
    assert jnp.max(jnp.abs(logits_bf16.astype(jnp.float32) - expected)) < 0.15

    print("KERNEL_OK")
</pallas_src>

<mosaic_0001>
module attributes {stable_mosaic.version = 11 : i64} {
  func.func @_mlp_kernel(%arg0: i32, %arg1: memref<16x128xf32, #tpu.memory_space<vmem>>, %arg2: memref<128x128xf32, #tpu.memory_space<vmem>>, %arg3: memref<1x128xf32, #tpu.memory_space<vmem>>, %arg4: memref<128x128xf32, #tpu.memory_space<vmem>>, %arg5: memref<1x128xf32, #tpu.memory_space<vmem>>, %arg6: memref<128x128xf32, #tpu.memory_space<vmem>>, %arg7: memref<1x128xf32, #tpu.memory_space<vmem>>, %arg8: memref<16x128xf32, #tpu.memory_space<vmem>>) attributes {dimension_semantics = [#tpu.dimension_semantics<parallel>], iteration_bounds = array<i64: 1>, scalar_prefetch = 0 : i64, scratch_operands = 0 : i64, tpu.core_type = #tpu.core_type<tc>, window_params = [{transform_indices = @transform_0, window_bounds = array<i64: 16, 128>}, {pipeline_mode = #tpu.pipeline_mode<synchronous>, transform_indices = @transform_1, window_bounds = array<i64: 128, 128>}, {pipeline_mode = #tpu.pipeline_mode<synchronous>, transform_indices = @transform_2, window_bounds = array<i64: 1, 128>}, {pipeline_mode = #tpu.pipeline_mode<synchronous>, transform_indices = @transform_3, window_bounds = array<i64: 128, 128>}, {pipeline_mode = #tpu.pipeline_mode<synchronous>, transform_indices = @transform_4, window_bounds = array<i64: 1, 128>}, {pipeline_mode = #tpu.pipeline_mode<synchronous>, transform_indices = @transform_5, window_bounds = array<i64: 128, 128>}, {pipeline_mode = #tpu.pipeline_mode<synchronous>, transform_indices = @transform_6, window_bounds = array<i64: 1, 128>}, {transform_indices = @transform_7, window_bounds = array<i64: 16, 128>}]} {
    %c0 = arith.constant 0 : index
    %c0_0 = arith.constant 0 : index
    %0 = vector.load %arg1[%c0, %c0_0] : memref<16x128xf32, #tpu.memory_space<vmem>>, vector<16x128xf32>
    %c0_1 = arith.constant 0 : index
    %c0_2 = arith.constant 0 : index
    %1 = vector.load %arg2[%c0_1, %c0_2] : memref<128x128xf32, #tpu.memory_space<vmem>>, vector<128x128xf32>
    %cst = arith.constant dense<0.000000e+00> : vector<16x128xf32>
    %2 = tpu.matmul %0, %1, %cst {dimension_numbers = #tpu.dot_dimension_numbers<[1], [0], [0], [1], [0, 0, 1, 1], [], []>} : vector<16x128xf32>, vector<128x128xf32>, vector<16x128xf32> -> vector<16x128xf32>
    %c0_3 = arith.constant 0 : index
    %c0_4 = arith.constant 0 : index
    %3 = vector.load %arg3[%c0_3, %c0_4] : memref<1x128xf32, #tpu.memory_space<vmem>>, vector<1x128xf32>
    %4 = vector.broadcast %3 : vector<1x128xf32> to vector<16x128xf32>
    %5 = arith.addf %2, %4 : vector<16x128xf32>
    %cst_5 = arith.constant 0.000000e+00 : f32
    %6 = vector.broadcast %cst_5 : f32 to vector<16x128xf32>
    %7 = arith.maximumf %5, %6 : vector<16x128xf32>
    %c0_6 = arith.constant 0 : index
    %c0_7 = arith.constant 0 : index
    %8 = vector.load %arg4[%c0_6, %c0_7] : memref<128x128xf32, #tpu.memory_space<vmem>>, vector<128x128xf32>
    %cst_8 = arith.constant dense<0.000000e+00> : vector<16x128xf32>
    %9 = tpu.matmul %7, %8, %cst_8 {dimension_numbers = #tpu.dot_dimension_numbers<[1], [0], [0], [1], [0, 0, 1, 1], [], []>} : vector<16x128xf32>, vector<128x128xf32>, vector<16x128xf32> -> vector<16x128xf32>
    %c0_9 = arith.constant 0 : index
    %c0_10 = arith.constant 0 : index
    %10 = vector.load %arg5[%c0_9, %c0_10] : memref<1x128xf32, #tpu.memory_space<vmem>>, vector<1x128xf32>
    %11 = vector.broadcast %10 : vector<1x128xf32> to vector<16x128xf32>
    %12 = arith.addf %9, %11 : vector<16x128xf32>
    %cst_11 = arith.constant 0.000000e+00 : f32
    %13 = vector.broadcast %cst_11 : f32 to vector<16x128xf32>
    %14 = arith.maximumf %12, %13 : vector<16x128xf32>
    %c0_12 = arith.constant 0 : index
    %c0_13 = arith.constant 0 : index
    %15 = vector.load %arg6[%c0_12, %c0_13] : memref<128x128xf32, #tpu.memory_space<vmem>>, vector<128x128xf32>
    %cst_14 = arith.constant dense<0.000000e+00> : vector<16x128xf32>
    %16 = tpu.matmul %14, %15, %cst_14 {dimension_numbers = #tpu.dot_dimension_numbers<[1], [0], [0], [1], [0, 0, 1, 1], [], []>} : vector<16x128xf32>, vector<128x128xf32>, vector<16x128xf32> -> vector<16x128xf32>
    %c0_15 = arith.constant 0 : index
    %c0_16 = arith.constant 0 : index
    %17 = vector.load %arg7[%c0_15, %c0_16] : memref<1x128xf32, #tpu.memory_space<vmem>>, vector<1x128xf32>
    %18 = vector.broadcast %17 : vector<1x128xf32> to vector<16x128xf32>
    %19 = arith.addf %16, %18 : vector<16x128xf32>
    %c0_17 = arith.constant 0 : index
    %c0_18 = arith.constant 0 : index
    %20 = vector.load %arg8[%c0_17, %c0_18] : memref<16x128xf32, #tpu.memory_space<vmem>>, vector<16x128xf32>
    tpu.vector_store %arg8[%c0_17, %c0_18], %19 {strides = array<i32>} : memref<16x128xf32, #tpu.memory_space<vmem>>, vector<16x128xf32>,
    return
  }
  func.func @transform_0(%arg0: i32) -> (i32, i32) {
    %c0_i32 = arith.constant 0 : i32
    %c0_i32_0 = arith.constant 0 : i32
    return %arg0, %c0_i32 : i32, i32
  }
  func.func @transform_1(%arg0: i32) -> (i32, i32) {
    %c0_i32 = arith.constant 0 : i32
    %c0_i32_0 = arith.constant 0 : i32
    %c0_i32_1 = arith.constant 0 : i32
    return %c0_i32, %c0_i32_0 : i32, i32
  }
  func.func @transform_2(%arg0: i32) -> (i32, i32) {
    %c0_i32 = arith.constant 0 : i32
    %c0_i32_0 = arith.constant 0 : i32
    %c0_i32_1 = arith.constant 0 : i32
    return %c0_i32, %c0_i32_0 : i32, i32
  }
  func.func @transform_3(%arg0: i32) -> (i32, i32) {
    %c0_i32 = arith.constant 0 : i32
    %c0_i32_0 = arith.constant 0 : i32
    %c0_i32_1 = arith.constant 0 : i32
    return %c0_i32, %c0_i32_0 : i32, i32
  }
  func.func @transform_4(%arg0: i32) -> (i32, i32) {
    %c0_i32 = arith.constant 0 : i32
    %c0_i32_0 = arith.constant 0 : i32
    %c0_i32_1 = arith.constant 0 : i32
    return %c0_i32, %c0_i32_0 : i32, i32
  }
  func.func @transform_5(%arg0: i32) -> (i32, i32) {
    %c0_i32 = arith.constant 0 : i32
    %c0_i32_0 = arith.constant 0 : i32
    %c0_i32_1 = arith.constant 0 : i32
    return %c0_i32, %c0_i32_0 : i32, i32
  }
  func.func @transform_6(%arg0: i32) -> (i32, i32) {
    %c0_i32 = arith.constant 0 : i32
    %c0_i32_0 = arith.constant 0 : i32
    %c0_i32_1 = arith.constant 0 : i32
    return %c0_i32, %c0_i32_0 : i32, i32
  }
  func.func @transform_7(%arg0: i32) -> (i32, i32) {
    %c0_i32 = arith.constant 0 : i32
    %c0_i32_0 = arith.constant 0 : i32
    return %arg0, %c0_i32 : i32, i32
  }
}

</mosaic_0001>

<bundles_post_ra>
// kernel: tpu_custom_call.1
= control target key start
LH: loop header
LB: loop body
LE: loop exit
PB: predicated region body
PF: predicated region fallthrough
CT: control target
= control target key end

     0   :  { %12 = vsyncpa [#allocation3], 0  ;;  %s928_s0 = inlined_call_operand.hbm [shape: f32[2,128], index: 0, kind: input, shape index: {}]   ;;  %s929_s1 = inlined_call_operand.hbm [shape: f32[128,128], index: 1, kind: input, shape index: {}]   ;;  %s930_s2 = inlined_call_operand.vmem [shape: f32[1,128], index: 2, kind: input, shape index: {}]   ;;  %s931_s3 = inlined_call_operand.hbm [shape: f32[128,128], index: 3, kind: input, shape index: {}]   ;;  %s932_s4 = inlined_call_operand.vmem [shape: f32[1,128], index: 4, kind: input, shape index: {}]   ;;  %s933_s5 = inlined_call_operand.hbm [shape: f32[128,128], index: 5, kind: input, shape index: {}]   ;;  %s934_s6 = inlined_call_operand.vmem [shape: f32[1,128], index: 6, kind: input, shape index: {}]   ;;  %s935_s7 = inlined_call_operand.hbm [shape: f32[2,128], index: 7, kind: output, shape index: {}]  }
   0x1   :  { %13 = vsyncpa [#allocation6], 0 }
   0x2   :  { %14 = vsyncpa [#allocation9], 0 }
   0x3   :  { %15 = vsyncpa [#allocation4], 0 }
   0x4   :  { %20 = vsyncadd [#allocation3], 224  ;;  %s788_s24 = smov [#allocation5]   ;;  %s670_s28 = scalar_lea.hbm %s929_s1, 2048 }
   0x5   :  { %s33_s25 = sshll.u32 %s788_s24, 4  ;;  %p671_p0 = scmp.ne.s32.totalorder %s929_s1, %s670_s28  ;;  %s34_s25 = int_to_ptr.vmem [resolvable:$true] %s33_s25 }
   0x6   :  { %p674_p1 = scmp.lt.u32.totalorder %s670_s28, %s929_s1 }
   0x8   :  { %p676_p2 = pnand %p674_p1, %p671_p0 }
   0xa   :  { %679 = shalt.err (!%p676_p2)
}
   0xb   :  { %s680_s10 = scalar_lea.vmem %s34_s25, 2048  ;;  %p685_p4 = scmp.lt.s32.totalorder %s34_s25, %s34_s25 }
   0xc   :  { %p681_p3 = scmp.ne.s32.totalorder %s34_s25, %s680_s10  ;;  %p686_p5 = scmp.lt.s32.totalorder %s680_s10, %s680_s10 }
   0xe   :  { %p687_p6 = por %p686_p5, %p685_p4 }
  0x10   :  { %p688_p7 = pnand %p687_p6, %p681_p3 }
  0x12   :  { %691 = shalt.err (!%p688_p7)
}
  0x13   :  { %s789_s11 = smov 128   ;;  %s790_s12 = smov 8  }
  0x14   :  { %39 = dma.hbm_to_vmem [thread:$0]  %s929_s1, 2048, %s34_s25, [#allocation6], %s789_s11, %s789_s11, %s790_s12  }
  0x15   :  { %s791_s15 = smov [#allocation2]   ;;  %s692_s19 = scalar_lea.hbm %s928_s0, 32 }
  0x16   :  { %s21_s16 = sshll.u32 %s791_s15, 4  ;;  %p693_p8 = scmp.ne.s32.totalorder %s928_s0, %s692_s19  ;;  %s22_s16 = int_to_ptr.vmem [resolvable:$true] %s21_s16 }
  0x17   :  { %p696_p9 = scmp.lt.u32.totalorder %s692_s19, %s928_s0 }
  0x19   :  { %p698_p10 = pnand %p696_p9, %p693_p8 }
  0x1b   :  { %701 = shalt.err (!%p698_p10)
}
  0x1c   :  { %s702_s24 = scalar_lea.vmem %s22_s16, 32  ;;  %s706_s1 = scalar_lea.vmem %s22_s16, 256 }
  0x1d   :  { %p703_p11 = scmp.ne.s32.totalorder %s22_s16, %s702_s24  ;;  %p707_p12 = scmp.lt.s32.totalorder %s22_s16, %s22_s16 }
  0x1e   :  { %p708_p13 = scmp.lt.s32.totalorder %s706_s1, %s702_s24 }
  0x20   :  { %p709_p0 = por %p708_p13, %p707_p12 }
  0x22   :  { %p710_p1 = pnand %p709_p0, %p703_p11 }
  0x24   :  { %713 = shalt.err (!%p710_p1)
}
  0x25   :  { %s792_s25 = smov 32   ;;  %s793_s26 = smov 2  }
  0x26   :  { %27 = dma.hbm_to_vmem [thread:$0]  %s928_s0, 32, %s22_s16, [#allocation3], %s792_s25, %s792_s25, %s793_s26  }
  0x27   :  { %s794_s29 = smov [#allocation7]   ;;  %s795_s8 = smov [#allocation8]  }
  0x28   :  { %s47_s30 = sshll.u32 %s794_s29, 4  ;;  %s61_s9 = sshll.u32 %s795_s8, 4  ;;  %s48_s30 = int_to_ptr.vmem [resolvable:$true] %s47_s30  ;;  %s867_s9 = int_to_ptr.vmem [resolvable:$true] %s61_s9 }
  0x29   :  { %s714_s14 = scalar_lea.hbm %s931_s3, 2048 }
  0x2a   :  { %p715_p2 = scmp.ne.s32.totalorder %s931_s3, %s714_s14  ;;  %p718_p3 = scmp.lt.u32.totalorder %s714_s14, %s931_s3 }
  0x2c   :  { %p720_p4 = pnand %p718_p3, %p715_p2 }
  0x2e   :  { %723 = shalt.err (!%p720_p4)
}
  0x2f   :  { %s724_s0 = scalar_lea.vmem %s48_s30, 2048  ;;  %p729_p6 = scmp.lt.s32.totalorder %s48_s30, %s48_s30 }
  0x30   :  { %p725_p5 = scmp.ne.s32.totalorder %s48_s30, %s724_s0  ;;  %p730_p7 = scmp.lt.s32.totalorder %s724_s0, %s724_s0 }
  0x32   :  { %p731_p8 = por %p730_p7, %p729_p6 }
  0x34   :  { %p732_p9 = pnand %p731_p8, %p725_p5 }
  0x36   :  { %735 = shalt.err (!%p732_p9)
}
  0x37   :  { %53 = dma.hbm_to_vmem [thread:$0]  %s931_s3, 2048, %s48_s30, [#allocation6], %s789_s11, %s789_s11, %s790_s12  }
  0x38   :  { %s736_s23 = scalar_lea.hbm %s933_s5, 2048 }
  0x39   :  { %p737_p10 = scmp.ne.s32.totalorder %s933_s5, %s736_s23  ;;  %p740_p11 = scmp.lt.u32.totalorder %s736_s23, %s933_s5 }
  0x3b   :  { %p742_p12 = pnand %p740_p11, %p737_p10 }
  0x3d   :  { %745 = shalt.err (!%p742_p12)
}
  0x3e   :  { %s746_s29 = scalar_lea.vmem %s867_s9, 2048  ;;  %p751_p0 = scmp.lt.s32.totalorder %s867_s9, %s867_s9 }
  0x3f   :  { %p747_p13 = scmp.ne.s32.totalorder %s867_s9, %s746_s29  ;;  %p752_p1 = scmp.lt.s32.totalorder %s746_s29, %s746_s29 }
  0x41   :  { %p753_p2 = por %p752_p1, %p751_p0 }
  0x43   :  { %p754_p3 = pnand %p753_p2, %p747_p13 }
  0x45   :  { %757 = shalt.err (!%p754_p3)
}
  0x46   :  { %67 = dma.hbm_to_vmem [thread:$0]  %s933_s5, 2048, %s867_s9, [#allocation9], %s789_s11, %s789_s11, %s790_s12  }
  0x47   :  { %780 = dma.done.wait [#allocation3], 256  }
  0x48   :  { %781 = vsyncadd [#allocation3], 4294967040 }
  0x49   :  { %782 = dma.done.wait [#allocation6], 4096  }
  0x4a   :  { %783 = vsyncadd [#allocation6], 4294963200 }
  0x4b   :  { %784 = dma.done.wait [#allocation9], 2048  }
  0x4c   :  { %785 = vsyncadd [#allocation9], 4294965248  ;;  %v84_v0 = vld [vmem:[#allocation5] sm:$0xff]  ;;  %v85_v1 = vld [vmem:[#allocation5 + $0x8] sm:$0xff] }
  0x4d   :  { %v86_v2 = vld [vmem:[#allocation5 + $0x10] sm:$0xff]  ;;  %v565_v3 = vpack.c.bf16 %v85_v1, %v84_v0  ;;  %v87_v4 = vld [vmem:[#allocation5 + $0x18] sm:$0xff]  ;;  %v88_v6 = vld [vmem:[#allocation5 + $0x20] sm:$0xff] }
  0x4e   :  { %v569_v5 = vpack.c.bf16 %v87_v4, %v86_v2  ;;  %v89_v7 = vld [vmem:[#allocation5 + $0x28] sm:$0xff]  ;;  %v90_v9 = vld [vmem:[#allocation5 + $0x30] sm:$0xff]  ;;  %v91_v10 = vld [vmem:[#allocation5 + $0x38] sm:$0xff] }
  0x4f   :  { %566 = vmatprep.subr.bf16.mxu0 %v565_v3  ;;  %v573_v8 = vpack.c.bf16 %v89_v7, %v88_v6  ;;  %v82_v11 = vld [vmem:[#allocation2] sm:$0xff]  ;;  %v184_v12 = vld [vmem:[#allocation7] sm:$0xff]  ;;  %v185_v13 = vld [vmem:[#allocation7 + $0x8] sm:$0xff]  ;;  %v577_v20 = vpack.c.bf16 %v91_v10, %v90_v9 }
  0x50   :  { %568 = vmatpush3.bf16.msra.mxu0 %v565_v3  ;;  %492 = vmatprep.mubr.f32.mxu0 %v82_v11  ;;  %v186_v14 = vld [vmem:[#allocation7 + $0x10] sm:$0xff]  ;;  %v597_v15 = vpack.c.bf16 %v185_v13, %v184_v12  ;;  %v187_v16 = vld [vmem:[#allocation7 + $0x18] sm:$0xff]  ;;  %v188_v18 = vld [vmem:[#allocation7 + $0x20] sm:$0xff] }
  0x51   :  { %570 = vmatprep.subr.bf16.mxu0 %v569_v5  ;;  %v601_v17 = vpack.c.bf16 %v187_v16, %v186_v14  ;;  %v189_v19 = vld [vmem:[#allocation7 + $0x28] sm:$0xff]  ;;  %v92_v21 = vld [vmem:[#allocation5 + $0x40] sm:$0xff]  ;;  %v190_v24 = vld [vmem:[#allocation7 + $0x30] sm:$0xff] }
  0x52   :  { %598 = vmatprep.subr.bf16.mxu1 %v597_v15  ;;  %v93_v22 = vld [vmem:[#allocation5 + $0x48] sm:$0xff]  ;;  %v605_v23 = vpack.c.bf16 %v189_v19, %v188_v18  ;;  %v191_v25 = vld [vmem:[#allocation7 + $0x38] sm:$0xff]  ;;  %v94_v27 = vld [vmem:[#allocation5 + $0x50] sm:$0xff] }
  0x53   :  { %600 = vmatpush3.bf16.msra.mxu1 %v597_v15  ;;  %v581_v26 = vpack.c.bf16 %v93_v22, %v92_v21  ;;  %v95_v28 = vld [vmem:[#allocation5 + $0x58] sm:$0xff]  ;;  %v609_v29 = vpack.c.bf16 %v191_v25, %v190_v24  ;;  %v192_v30 = vld [vmem:[#allocation7 + $0x40] sm:$0xff]  ;;  %v193_v31 = vld [vmem:[#allocation7 + $0x48] sm:$0xff] }
  0x54   :  { %572 = vmatpush3.bf16.msra.mxu0 %v569_v5  ;;  %602 = vmatprep.subr.bf16.mxu1 %v601_v17  ;;  %v585_v32 = vpack.c.bf16 %v95_v28, %v94_v27  ;;  %v96_v33 = vld [vmem:[#allocation5 + $0x60] sm:$0xff]  ;;  %v97_v34 = vld [vmem:[#allocation5 + $0x68] sm:$0xff]  ;;  %v613_v35 = vpack.c.bf16 %v193_v31, %v192_v30  ;;  %v194_v36 = vld [vmem:[#allocation7 + $0x50] sm:$0xff] }
  0x55   :  { %574 = vmatprep.subr.bf16.mxu0 %v573_v8  ;;  %v195_v37 = vld [vmem:[#allocation7 + $0x58] sm:$0xff]  ;;  %v589_v38 = vpack.c.bf16 %v97_v34, %v96_v33  ;;  %v98_v39 = vld [vmem:[#allocation5 + $0x70] sm:$0xff]  ;;  %v196_v42 = vld [vmem:[#allocation7 + $0x60] sm:$0xff] }
  0x56   :  { %v99_v40 = vld [vmem:[#allocation5 + $0x78] sm:$0xff]  ;;  %v617_v41 = vpack.c.bf16 %v195_v37, %v194_v36  ;;  %v197_v43 = vld [vmem:[#allocation7 + $0x68] sm:$0xff]  ;;  %v198_v47 = vld [vmem:[#allocation7 + $0x70] sm:$0xff] }
  0x57   :  { %604 = vmatpush3.bf16.msra.mxu1 %v601_v17  ;;  %v593_v44 = vpack.c.bf16 %v99_v40, %v98_v39  ;;  %v621_v45 = vpack.c.bf16 %v197_v43, %v196_v42  ;;  %v83_v46 = vld [vmem:[#allocation2 + $0x8] sm:$0xff]  ;;  %v284_v50 = vld [vmem:[#allocation8] sm:$0xff]  ;;  %v285_v51 = vld [vmem:[#allocation8 + $0x8] sm:$0xff] }
  0x58   :  { %576 = vmatpush3.bf16.msra.mxu0 %v573_v8  ;;  %606 = vmatprep.subr.bf16.mxu1 %v605_v23  ;;  %v199_v48 = vld [vmem:[#allocation7 + $0x78] sm:$0xff]  ;;  %v286_v52 = vld [vmem:[#allocation8 + $0x10] sm:$0xff]  ;;  %v629_v53 = vpack.c.bf16 %v285_v51, %v284_v50  ;;  %v288_v56 = vld [vmem:[#allocation8 + $0x20] sm:$0xff] }
  0x59   :  { %578 = vmatprep.subr.bf16.mxu0 %v577_v20  ;;  %v625_v49 = vpack.c.bf16 %v199_v48, %v198_v47  ;;  %v287_v54 = vld [vmem:[#allocation8 + $0x18] sm:$0xff]  ;;  %v289_v57 = vld [vmem:[#allocation8 + $0x28] sm:$0xff]  ;;  %v290_v59 = vld [vmem:[#allocation8 + $0x30] sm:$0xff] }
  0x5a   :  { %v633_v55 = vpack.c.bf16 %v287_v54, %v286_v52  ;;  %v637_v58 = vpack.c.bf16 %v289_v57, %v288_v56  ;;  %v291_v60 = vld [vmem:[#allocation8 + $0x38] sm:$0xff]  ;;  %v292_v62 = vld [vmem:[#allocation8 + $0x40] sm:$0xff]  ;;  %v293_v63 = vld [vmem:[#allocation8 + $0x48] sm:$0xff] }
  0x5b   :  { %608 = vmatpush3.bf16.msra.mxu1 %v605_v23  ;;  %v641_v61 = vpack.c.bf16 %v291_v60, %v290_v59  ;;  %v645_v0 = vpack.c.bf16 %v293_v63, %v292_v62  ;;  %v294_v1 = vld [vmem:[#allocation8 + $0x50] sm:$0xff]  ;;  %v295_v2 = vld [vmem:[#allocation8 + $0x58] sm:$0xff]  ;;  %v296_v4 = vld [vmem:[#allocation8 + $0x60] sm:$0xff] }
  0x5c   :  { %580 = vmatpush3.bf16.msra.mxu0 %v577_v20  ;;  %610 = vmatprep.subr.bf16.mxu1 %v609_v29  ;;  %v649_v3 = vpack.c.bf16 %v295_v2, %v294_v1  ;;  %v297_v5 = vld [vmem:[#allocation8 + $0x68] sm:$0xff]  ;;  %v403_v7 = vld [vmem:[%s930_s2] ss:$0 sm:$0xff]  ;;  %v299_v15 = vld [vmem:[#allocation8 + $0x78] sm:$0xff] }
  0x5d   :  { %582 = vmatprep.subr.bf16.mxu0 %v581_v26  ;;  %v653_v6 = vpack.c.bf16 %v297_v5, %v296_v4  ;;  %v298_v14 = vld [vmem:[#allocation8 + $0x70] sm:$0xff] }
  0x5e   :  { %v657_v16 = vpack.c.bf16 %v299_v15, %v298_v14  ;;  %v404_v17 = vld [vmem:[%s932_s4] ss:$0 sm:$0xff] }
  0x5f   :  { %612 = vmatpush3.bf16.msra.mxu1 %v609_v29  ;;  %v405_v24 = vld [vmem:[%s934_s6] ss:$0 sm:$0xff] }
  0x60   :  { %584 = vmatpush3.bf16.msra.mxu0 %v581_v26  ;;  %614 = vmatprep.subr.bf16.mxu1 %v613_v35 }
  0x61   :  { %586 = vmatprep.subr.bf16.mxu0 %v585_v32 }
  0x63   :  { %616 = vmatpush3.bf16.msra.mxu1 %v613_v35 }
  0x64   :  { %588 = vmatpush3.bf16.msra.mxu0 %v585_v32  ;;  %618 = vmatprep.subr.bf16.mxu1 %v617_v41 }
  0x65   :  { %590 = vmatprep.subr.bf16.mxu0 %v589_v38 }
  0x67   :  { %620 = vmatpush3.bf16.msra.mxu1 %v617_v41 }
  0x68   :  { %592 = vmatpush3.bf16.msra.mxu0 %v589_v38  ;;  %622 = vmatprep.subr.bf16.mxu1 %v621_v45 }
  0x69   :  { %594 = vmatprep.subr.bf16.mxu0 %v593_v44 }
  0x6b   :  { %624 = vmatpush3.bf16.msra.mxu1 %v621_v45 }
  0x6c   :  { %596 = vmatpush3.bf16.msra.mxu0 %v593_v44  ;;  %626 = vmatprep.subr.bf16.mxu1 %v625_v49 }
  0x6d   :  { %630 = vmatprep.subr.bf16.mxu0 %v629_v53 }
  0x6f   :  { %493 = vmatmul.mubr.f32.vlgmr.msra.gmra.mrb[0].mxu0 %v83_v46  ;;  %628 = vmatpush3.bf16.msra.mxu1 %v625_v49 }
  0x70   :  { %632 = vmatpush3.bf16.msra.mxu0 %v629_v53 }
  0x71   :  { %634 = vmatprep.subr.bf16.mxu0 %v633_v55 }
  0x74   :  { %636 = vmatpush3.bf16.msra.mxu0 %v633_v55 }
  0x75   :  { %638 = vmatprep.subr.bf16.mxu0 %v637_v58 }
  0x78   :  { %640 = vmatpush3.bf16.msra.mxu0 %v637_v58 }
  0x79   :  { %642 = vmatprep.subr.bf16.mxu0 %v641_v61 }
  0x7c   :  { %644 = vmatpush3.bf16.msra.mxu0 %v641_v61 }
  0x7d   :  { %646 = vmatprep.subr.bf16.mxu0 %v645_v0 }
  0x80   :  { %648 = vmatpush3.bf16.msra.mxu0 %v645_v0 }
  0x81   :  { %650 = vmatprep.subr.bf16.mxu0 %v649_v3 }
  0x84   :  { %652 = vmatpush3.bf16.msra.mxu0 %v649_v3 }
  0x85   :  { %654 = vmatprep.subr.bf16.mxu0 %v653_v6 }
  0x88   :  { %656 = vmatpush3.bf16.msra.mxu0 %v653_v6 }
  0x89   :  { %658 = vmatprep.subr.bf16.mxu0 %v657_v16 }
  0x8c   :  { %660 = vmatpush3.bf16.msra.mxu0 %v657_v16 }
 0x142   :  { %v494_v8 = vpop.f32.mrb[0].mxu0 }
 0x143   :  { %v179_v9 = vadd.f32 %v494_v8, %v403_v7  ;;  %v173_v10 = vpop.f32.mrb[1].mxu0 }
 0x144   :  { %v174_v11 = vadd.f32 %v403_v7, %v173_v10 }
 0x145   :  { %v183_v13 = vmax.f32 %v179_v9, 0.0 }
 0x146   :  { %v182_v12 = vmax.f32 %v174_v11, 0.0 }
 0x148   :  { %527 = vmatprep.mubr.f32.mxu1 %v182_v12 }
 0x149   :  { %528 = vmatmul.mubr.f32.vlgmr.msra.gmra.mrb[0].mxu1 %v183_v13 }
 0x21c   :  { %v529_v18 = vpop.f32.mrb[0].mxu1 }
 0x21d   :  { %v279_v19 = vadd.f32 %v529_v18, %v404_v17  ;;  %v273_v20 = vpop.f32.mrb[1].mxu1 }
 0x21e   :  { %v274_v21 = vadd.f32 %v404_v17, %v273_v20 }
 0x21f   :  { %v283_v23 = vmax.f32 %v279_v19, 0.0 }
 0x220   :  { %v282_v22 = vmax.f32 %v274_v21, 0.0 }
 0x222   :  { %562 = vmatprep.mubr.f32.mxu0 %v282_v22 }
 0x223   :  { %563 = vmatmul.mubr.f32.vlgmr.msra.gmra.mrb[2].mxu0 %v283_v23 }
 0x2f6   :  { %v564_v25 = vpop.f32.mrb[2].mxu0 }
 0x2f7   :  { %v379_v26 = vadd.f32 %v564_v25, %v405_v24  ;;  %v373_v27 = vpop.f32.mrb[3].mxu0 }
 0x2f8   :  { %v374_v28 = vadd.f32 %v405_v24, %v373_v27 }
 0x2f9   :  { %383 = vst [vmem:[#allocation10 + $0x8] sm:$0xff] %v379_v26 }
 0x2fa   :  { %382 = vst [vmem:[#allocation10] sm:$0xff] %v374_v28 }
 0x2fb   :  { %388 = vsyncadd [#allocation4], 224  ;;  %s796_s4 = smov [#allocation10]  }
 0x2fc   :  { %s389_s10 = sshll.u32 %s796_s4, 4  ;;  %s390_s10 = int_to_ptr.vmem [resolvable:$true] %s389_s10 }
 0x2fd   :  { %s758_s13 = scalar_lea.vmem %s390_s10, 32  ;;  %s762_s14 = scalar_lea.vmem %s390_s10, 256 }
 0x2fe   :  { %p759_p4 = scmp.ne.s32.totalorder %s390_s10, %s758_s13  ;;  %p763_p5 = scmp.lt.s32.totalorder %s390_s10, %s390_s10 }
 0x2ff   :  { %p764_p6 = scmp.lt.s32.totalorder %s762_s14, %s758_s13 }
 0x301   :  { %p765_p7 = por %p764_p6, %p763_p5 }
 0x303   :  { %p766_p8 = pnand %p765_p7, %p759_p4 }
 0x305   :  { %769 = shalt.err (!%p766_p8)
}
 0x306   :  { %s770_s17 = scalar_lea.hbm %s935_s7, 32 }
 0x307   :  { %p771_p9 = scmp.ne.s32.totalorder %s935_s7, %s770_s17  ;;  %p774_p10 = scmp.lt.u32.totalorder %s770_s17, %s935_s7 }
 0x309   :  { %p776_p11 = pnand %p774_p10, %p771_p9 }
 0x30b   :  { %779 = shalt.err (!%p776_p11)
}
 0x30c   :  { %395 = dma.vmem_to_hbm [thread:$0]  %s390_s10, 32, %s935_s7, [#allocation4], %s792_s25, %s792_s25, %s793_s26  }
 0x30d   :  { %786 = dma.done.wait [#allocation4], 256  }
 0x30e   :  { %787 = vsyncadd [#allocation4], 4294967040 }
 0x30f   :  { %399 = vsyncpa [#allocation3], 1 }
 0x310   :  { %400 = vsyncpa [#allocation6], 1 }
 0x311   :  { %401 = vsyncpa [#allocation9], 1 }
 0x312   :  { %402 = vsyncpa [#allocation4], 1 }

</bundles_post_ra>
